<compile_context>
chip_gen: v6e
topology: v6e:2x2x1
jax: 0.10.0
libtpu: 0.0.40
codegen_flags: <defaults>
</compile_context>

<pallas_src>
import functools

import jax
import jax.numpy as jnp
from jax import lax
from jax.experimental import pallas as pl
from jax.experimental.pallas import tpu as pltpu

_LANE = 128
_SUBLANE = 8
_TILE_BYTES = 4 * 1024 * 1024      # target bytes per streamed input tile (x2 double-buffer)


def _round_up(n, m):
    return ((n + m - 1) // m) * m


@functools.lru_cache(maxsize=None)
def _vmem_limit_bytes():
    """~3/4 of this chip's VMEM, capped at 96 MiB; 48 MiB fallback if unknown."""
    cap = 0
    try:
        cap = int(getattr(pltpu.get_tpu_info(), "vmem_capacity_bytes", 0))
    except Exception:
        cap = 0
    if cap <= 0:
        cap = 64 * 1024 * 1024     # assume the smallest (v7x-sized) VMEM
    return int(min(cap * 3 // 4, 96 * 1024 * 1024))


def _pick_lane_tile(d, bytes_per_lane, tile_bytes=_TILE_BYTES):
    """Last-dim tile: multiple of 128 and <= d (byte-targeted); full extent if d <= 128."""
    if d <= _LANE:
        return d
    cap = max(_LANE, (tile_bytes // max(1, bytes_per_lane)) // _LANE * _LANE)
    return min(cap, (d // _LANE) * _LANE)


def _pick_stats_tiles(b, c, hw, itemsize):
    """(b_tile, tk) for the channel-std kernel; b_tile is a multiple of 8 (or full B)."""
    b_min = b if b <= _SUBLANE else _SUBLANE
    tk = _pick_lane_tile(hw, b_min * c * itemsize)
    if b <= _SUBLANE:
        b_tile = b
    else:
        b_cap = max(1, _TILE_BYTES // max(1, c * tk * itemsize))
        b_tile = max(_SUBLANE, (min(b_cap, b) // _SUBLANE) * _SUBLANE)
        if b_tile >= b:
            # Keep >= 2 row tiles so the 'parallel' axis can shard across v7x's 2 TCs.
            b_tile = _round_up((b + 1) // 2, _SUBLANE)
    return b_tile, tk


# ---------------- 4-D path, stage 1: per-channel spatial std ------------------
def _chan_std_kernel(hw, ragged, x_ref, feat_ref, sum_ref, sumsq_ref):
    k = pl.program_id(1)

    @pl.when(k == 0)
    def _init():
        sum_ref[...] = jnp.zeros_like(sum_ref)
        sumsq_ref[...] = jnp.zeros_like(sumsq_ref)

    x = x_ref[...].astype(jnp.float32)                 # (b_tile, C, tk)
    if ragged:
        tk = x.shape[-1]
        lane = lax.broadcasted_iota(jnp.int32, x.shape, 2)
        x = jnp.where(k * tk + lane < hw, x, 0.0)      # mask ragged last HW tile
    sum_ref[...] += jnp.sum(x, axis=-1)
    sumsq_ref[...] += jnp.sum(x * x, axis=-1)

    @pl.when(k == pl.num_programs(1) - 1)
    def _finalize():
        s = sum_ref[...]
        ss = sumsq_ref[...]
        hw_f = jnp.float32(hw)
        # unbiased variance (ddof=1), clamped against catastrophic cancellation
        var = jnp.maximum(ss - (s * s) / hw_f, 0.0) / (hw_f - 1.0)
        feat_ref[...] = jnp.sqrt(var)


def _channel_std(x):
    b, c, h, w = x.shape
    hw = h * w
    x3 = x.reshape(b, c, hw)                           # metadata-only reshape
    itemsize = jnp.dtype(x.dtype).itemsize
    b_tile, tk = _pick_stats_tiles(b, c, hw, itemsize)
    ragged = (hw % tk) != 0
    n_b = pl.cdiv(b, b_tile)
    n_k = pl.cdiv(hw, tk)
    return pl.pallas_call(
        functools.partial(_chan_std_kernel, hw, ragged),
        out_shape=jax.ShapeDtypeStruct((b, c), jnp.float32),
        grid_spec=pltpu.PrefetchScalarGridSpec(
            num_scalar_prefetch=0,
            grid=(n_b, n_k),
            in_specs=[pl.BlockSpec((b_tile, c, tk), lambda bi, ki: (bi, 0, ki))],
            out_specs=pl.BlockSpec((b_tile, c), lambda bi, ki: (bi, 0)),
            scratch_shapes=[pltpu.VMEM((b_tile, c), jnp.float32),
                            pltpu.VMEM((b_tile, c), jnp.float32)],
        ),
        compiler_params=pltpu.CompilerParams(
            dimension_semantics=("parallel", "arbitrary"),
            vmem_limit_bytes=_vmem_limit_bytes(),
        ),
    )(x3)


# ---------------- cosine-similarity stage (rows of a (B, D) matrix) -----------
def _cosine_single_kernel(x_ref, r_ref):
    """Whole feature matrix resident: well-conditioned two-pass cosine."""
    x = x_ref[...].astype(jnp.float32)                 # (B, D)
    xc = x - jnp.mean(x, axis=1, keepdims=True)
    ss = jnp.sum(xc * xc, axis=1, keepdims=True)
    inv = 1.0 / (1e-8 + jnp.sqrt(ss))
    xn = xc * inv
    r = lax.dot_general(xn, xn, (((1,), (1,)), ((), ())),
                        preferred_element_type=jnp.float32)
    r_ref[...] = jnp.clip(r, -1.0, 1.0)


def _cosine_stream_kernel(d, ragged, x_ref, r_ref, scol_ref, sumsq_ref):
    """Streamed centered Gram: out_ref is the resident raw-Gram accumulator."""
    k = pl.program_id(0)

    @pl.when(k == 0)
    def _init():
        r_ref[...] = jnp.zeros_like(r_ref)
        scol_ref[...] = jnp.zeros_like(scol_ref)
        sumsq_ref[...] = jnp.zeros_like(sumsq_ref)

    x = x_ref[...]                                     # (B, tk), native dtype
    if ragged:
        tk = x.shape[-1]
        lane = lax.broadcasted_iota(jnp.int32, x.shape, 1)
        x = jnp.where(k * tk + lane < d, x, jnp.zeros_like(x))
    xf = x.astype(jnp.float32)
    # Raw Gram partial, NT form (contract dim 1 of both operands; no transpose
    # materialized); native dtype feeds the MXU, f32 accumulation.
    r_ref[...] += lax.dot_general(x, x, (((1,), (1,)), ((), ())),
                                  preferred_element_type=jnp.float32)
    scol_ref[...] += jnp.sum(xf, axis=1, keepdims=True)          # (B, 1)
    sumsq_ref[...] += jnp.sum(xf * xf, axis=1, keepdims=True)    # (B, 1)

    @pl.when(k == pl.num_programs(0) - 1)
    def _finalize():
        d_f = jnp.float32(d)
        s = scol_ref[...]                                        # (B, 1)
        g = r_ref[...]
        ssT = lax.dot_general(s, s, (((1,), (1,)), ((), ())),
                              preferred_element_type=jnp.float32)
        gc = g - ssT / d_f                                       # centered Gram
        # diag(gc) from streamed per-row stats (no (B,B) iota masks)
        diag = jnp.maximum(sumsq_ref[...] - (s * s) / d_f, 0.0)  # (B, 1)
        inv = 1.0 / (1e-8 + jnp.sqrt(diag))
        inv_outer = lax.dot_general(inv, inv, (((1,), (1,)), ((), ())),
                                    preferred_element_type=jnp.float32)
        r_ref[...] = jnp.clip(gc * inv_outer, -1.0, 1.0)


def _cosine(x2):
    b, d = x2.shape
    itemsize = jnp.dtype(x2.dtype).itemsize
    tk = _pick_lane_tile(d, b * itemsize)
    n_k = pl.cdiv(d, tk)
    params = pltpu.CompilerParams(
        dimension_semantics=("arbitrary",),
        vmem_limit_bytes=_vmem_limit_bytes(),
    )
    if n_k == 1:
        # tk == d here: single resident tile, two-pass math (better conditioned).
        return pl.pallas_call(
            _cosine_single_kernel,
            out_shape=jax.ShapeDtypeStruct((b, b), jnp.float32),
            grid_spec=pltpu.PrefetchScalarGridSpec(
                num_scalar_prefetch=0,
                grid=(1,),
                in_specs=[pl.BlockSpec((b, d), lambda k: (0, 0))],
                out_specs=pl.BlockSpec((b, b), lambda k: (0, 0)),
            ),
            compiler_params=params,
        )(x2)
    ragged = (d % tk) != 0
    # NOTE: the (B,B) Gram stays resident in VMEM; for B >~ 2k on v7x the output
    # should be tiled over row blocks instead (not needed at these batch sizes).
    return pl.pallas_call(
        functools.partial(_cosine_stream_kernel, d, ragged),
        out_shape=jax.ShapeDtypeStruct((b, b), jnp.float32),
        grid_spec=pltpu.PrefetchScalarGridSpec(
            num_scalar_prefetch=0,
            grid=(n_k,),
            in_specs=[pl.BlockSpec((b, tk), lambda k: (0, k))],
            out_specs=pl.BlockSpec((b, b), lambda k: (0, 0)),
            scratch_shapes=[pltpu.VMEM((b, 1), jnp.float32),
                            pltpu.VMEM((b, 1), jnp.float32)],
        ),
        compiler_params=params,
    )(x2)


def similarity_matrix(x):
    """Pallas port of the torch similarity_matrix forward."""
    if x.ndim == 4:
        b, c, h, _ = x.shape
        if c > 3 and h > 1:
            feat = _channel_std(x)           # (B, C) f32 per-channel spatial std
            return _cosine(feat)
        return _cosine(x.reshape(b, -1))
    return _cosine(x.reshape(x.shape[0], -1))


class SimilarityMatrix:
    """Stateless module wrapper (no parameters, mirrors the nn.Module)."""

    def __call__(self, x):
        return similarity_matrix(x)


def _reference(x):
    """Pure-JAX reference for correctness checks."""
    if x.ndim == 4 and x.shape[1] > 3 and x.shape[2] > 1:
        b, c = x.shape[0], x.shape[1]
        feat = jnp.std(x.reshape(b, c, -1).astype(jnp.float32), axis=2, ddof=1)
    else:
        feat = x.reshape(x.shape[0], -1).astype(jnp.float32)
    xc = feat - jnp.mean(feat, axis=1, keepdims=True)
    xn = xc / (1e-8 + jnp.sqrt(jnp.sum(xc ** 2, axis=1, keepdims=True)))
    return jnp.clip(xn @ xn.T, -1.0, 1.0)


if __name__ == "__main__":
    key = jax.random.PRNGKey(0)
    k1, k2, k3, k4, k5 = jax.random.split(key, 5)
    mod = SimilarityMatrix()

    # 1) 4-D NCHW, C > 3, H > 1 -> per-channel spatial-std path.
    chan_scale = 0.5 + jnp.arange(8.0).reshape(1, 8, 1, 1)
    x1 = jax.random.normal(k1, (2, 8, 16, 16), dtype=jnp.float32) * chan_scale
    r1 = jax.block_until_ready(mod(x1))
    assert r1.shape == (2, 2) and r1.dtype == jnp.float32
    assert jnp.allclose(r1, _reference(x1), atol=1e-5, rtol=1e-5)

    # 2) 4-D std path with ragged spatial tile (HW=150) and C not a multiple of 8.
    x2 = jax.random.normal(k2, (2, 12, 10, 15), dtype=jnp.float32) * \
        (0.5 + jnp.arange(12.0).reshape(1, 12, 1, 1))
    r2 = jax.block_until_ready(mod(x2))
    assert jnp.allclose(r2, _reference(x2), atol=1e-5, rtol=1e-5)

    # 3) 4-D std path with B > 8 (exercises row tiling + partial last row block).
    x3 = jax.random.normal(k3, (12, 8, 16, 16), dtype=jnp.float32) * chan_scale
    r3 = jax.block_until_ready(mod(x3))
    assert r3.shape == (12, 12)
    assert jnp.allclose(r3, _reference(x3), atol=1e-5, rtol=1e-5)

    # 4) 4-D NCHW with C <= 3 -> flattened streamed-Gram path (ragged D=192).
    x4 = jax.random.normal(k4, (4, 3, 8, 8), dtype=jnp.float32)
    r4 = jax.block_until_ready(mod(x4))
    assert jnp.allclose(r4, _reference(x4), atol=1e-5, rtol=1e-5)

    # 5) Plain 2-D input -> flattened streamed-Gram path (ragged D=160).
    x5 = jax.random.normal(k5, (4, 160), dtype=jnp.float32)
    r5 = jax.block_until_ready(mod(x5))
    assert jnp.allclose(r5, _reference(x5), atol=1e-5, rtol=1e-5)

    print("KERNEL_OK")
</pallas_src>

<mosaic_0001>
module attributes {stable_mosaic.version = 11 : i64} {
  func.func @_chan_std_kernel(%arg0: i32, %arg1: i32, %arg2: memref<2x8x256xf32, #tpu.memory_space<vmem>>, %arg3: memref<2x8xf32, #tpu.memory_space<vmem>>, %arg4: memref<2x8xf32, #tpu.memory_space<vmem>>, %arg5: memref<2x8xf32, #tpu.memory_space<vmem>>) attributes {dimension_semantics = [#tpu.dimension_semantics<parallel>, #tpu.dimension_semantics<arbitrary>], iteration_bounds = array<i64: 1, 1>, scalar_prefetch = 0 : i64, scratch_operands = 2 : i64, tpu.core_type = #tpu.core_type<tc>, window_params = [{transform_indices = @transform_0, window_bounds = array<i64: 2, 8, 256>}, {transform_indices = @transform_1, window_bounds = array<i64: 2, 8>}]} {
    %c0_i32 = arith.constant 0 : i32
    %0 = arith.cmpi eq, %arg1, %c0_i32 : i32
    %1 = arith.extui %0 : i1 to i32
    %c0_i32_0 = arith.constant 0 : i32
    %2 = arith.cmpi ne, %1, %c0_i32_0 : i32
    scf.if %2 {
      %cst_14 = arith.constant 0.000000e+00 : f32
      %16 = vector.broadcast %cst_14 : f32 to vector<2x8xf32>
      %c0_15 = arith.constant 0 : index
      %c0_16 = arith.constant 0 : index
      %17 = vector.load %arg4[%c0_15, %c0_16] : memref<2x8xf32, #tpu.memory_space<vmem>>, vector<2x8xf32>
      tpu.vector_store %arg4[%c0_15, %c0_16], %16 {strides = array<i32>} : memref<2x8xf32, #tpu.memory_space<vmem>>, vector<2x8xf32>,
      %cst_17 = arith.constant 0.000000e+00 : f32
      %18 = vector.broadcast %cst_17 : f32 to vector<2x8xf32>
      %c0_18 = arith.constant 0 : index
      %c0_19 = arith.constant 0 : index
      %19 = vector.load %arg5[%c0_18, %c0_19] : memref<2x8xf32, #tpu.memory_space<vmem>>, vector<2x8xf32>
      tpu.vector_store %arg5[%c0_18, %c0_19], %18 {strides = array<i32>} : memref<2x8xf32, #tpu.memory_space<vmem>>, vector<2x8xf32>,
    } else {
    }
    %c0 = arith.constant 0 : index
    %c0_1 = arith.constant 0 : index
    %c0_2 = arith.constant 0 : index
    %3 = vector.load %arg2[%c0, %c0_1, %c0_2] : memref<2x8x256xf32, #tpu.memory_space<vmem>>, vector<2x8x256xf32>
    %c0_3 = arith.constant 0 : index
    %c0_4 = arith.constant 0 : index
    %4 = vector.load %arg4[%c0_3, %c0_4] : memref<2x8xf32, #tpu.memory_space<vmem>>, vector<2x8xf32>
    %cst = arith.constant dense<0.000000e+00> : vector<2x8xf32>
    %5 = vector.multi_reduction <add>, %3, %cst [2] : vector<2x8x256xf32> to vector<2x8xf32>
    %6 = arith.addf %4, %5 : vector<2x8xf32>
    %c0_5 = arith.constant 0 : index
    %c0_6 = arith.constant 0 : index
    %7 = vector.load %arg4[%c0_5, %c0_6] : memref<2x8xf32, #tpu.memory_space<vmem>>, vector<2x8xf32>
    tpu.vector_store %arg4[%c0_5, %c0_6], %6 {strides = array<i32>} : memref<2x8xf32, #tpu.memory_space<vmem>>, vector<2x8xf32>,
    %c0_7 = arith.constant 0 : index
    %c0_8 = arith.constant 0 : index
    %8 = vector.load %arg5[%c0_7, %c0_8] : memref<2x8xf32, #tpu.memory_space<vmem>>, vector<2x8xf32>
    %9 = arith.mulf %3, %3 : vector<2x8x256xf32>
    %cst_9 = arith.constant dense<0.000000e+00> : vector<2x8xf32>
    %10 = vector.multi_reduction <add>, %9, %cst_9 [2] : vector<2x8x256xf32> to vector<2x8xf32>
    %11 = arith.addf %8, %10 : vector<2x8xf32>
    %c0_10 = arith.constant 0 : index
    %c0_11 = arith.constant 0 : index
    %12 = vector.load %arg5[%c0_10, %c0_11] : memref<2x8xf32, #tpu.memory_space<vmem>>, vector<2x8xf32>
    tpu.vector_store %arg5[%c0_10, %c0_11], %11 {strides = array<i32>} : memref<2x8xf32, #tpu.memory_space<vmem>>, vector<2x8xf32>,
    %c0_i32_12 = arith.constant 0 : i32
    %13 = arith.cmpi eq, %arg1, %c0_i32_12 : i32
    %14 = arith.extui %13 : i1 to i32
    %c0_i32_13 = arith.constant 0 : i32
    %15 = arith.cmpi ne, %14, %c0_i32_13 : i32
    scf.if %15 {
      %c0_14 = arith.constant 0 : index
      %c0_15 = arith.constant 0 : index
      %16 = vector.load %arg4[%c0_14, %c0_15] : memref<2x8xf32, #tpu.memory_space<vmem>>, vector<2x8xf32>
      %c0_16 = arith.constant 0 : index
      %c0_17 = arith.constant 0 : index
      %17 = vector.load %arg5[%c0_16, %c0_17] : memref<2x8xf32, #tpu.memory_space<vmem>>, vector<2x8xf32>
      %18 = arith.mulf %16, %16 : vector<2x8xf32>
      %cst_18 = arith.constant 2.560000e+02 : f32
      %19 = vector.broadcast %cst_18 : f32 to vector<2x8xf32>
      %20 = arith.divf %18, %19 : vector<2x8xf32>
      %21 = arith.subf %17, %20 : vector<2x8xf32>
      %cst_19 = arith.constant 0.000000e+00 : f32
      %22 = vector.broadcast %cst_19 : f32 to vector<2x8xf32>
      %23 = arith.maximumf %21, %22 : vector<2x8xf32>
      %cst_20 = arith.constant 2.560000e+02 : f32
      %cst_21 = arith.constant 1.000000e+00 : f32
      %24 = arith.subf %cst_20, %cst_21 : f32
      %25 = vector.broadcast %24 : f32 to vector<2x8xf32>
      %26 = arith.divf %23, %25 : vector<2x8xf32>
      %27 = math.sqrt %26 : vector<2x8xf32>
      %c0_22 = arith.constant 0 : index
      %c0_23 = arith.constant 0 : index
      %28 = vector.load %arg3[%c0_22, %c0_23] : memref<2x8xf32, #tpu.memory_space<vmem>>, vector<2x8xf32>
      tpu.vector_store %arg3[%c0_22, %c0_23], %27 {strides = array<i32>} : memref<2x8xf32, #tpu.memory_space<vmem>>, vector<2x8xf32>,
    } else {
    }
    return
  }
  func.func @transform_0(%arg0: i32, %arg1: i32) -> (i32, i32, i32) {
    %c0_i32 = arith.constant 0 : i32
    %c0_i32_0 = arith.constant 0 : i32
    return %arg0, %c0_i32, %arg1 : i32, i32, i32
  }
  func.func @transform_1(%arg0: i32, %arg1: i32) -> (i32, i32) {
    %c0_i32 = arith.constant 0 : i32
    %c0_i32_0 = arith.constant 0 : i32
    return %arg0, %c0_i32 : i32, i32
  }
}

</mosaic_0001>

<bundles_post_ra>
// kernel: tpu_custom_call.1
= control target key start
LH: loop header
LB: loop body
LE: loop exit
PB: predicated region body
PF: predicated region fallthrough
CT: control target
= control target key end

     0   :  { %6 = vsyncpa [#allocation5], 0  ;;  %s196_s0 = inlined_call_operand.hbm [shape: f32[2,8,256], index: 0, kind: input, shape index: {}]   ;;  %s197_s1 = inlined_call_operand.hbm [shape: f32[2,8], index: 1, kind: output, shape index: {}]  }
   0x1   :  { %7 = vsyncpa [#allocation6], 0  ;;  %s170_s6 = smov [#allocation4]  }
   0x2   :  { %s13_s7 = sshll.u32 %s170_s6, 4  ;;  %s14_s7 = int_to_ptr.vmem [resolvable:$true] %s13_s7 }
   0x3   :  { %s134_s8 = scalar_lea.vmem %s14_s7, 512  ;;  %p139_p1 = scmp.lt.s32.totalorder %s14_s7, %s14_s7 }
   0x4   :  { %p135_p0 = scmp.ne.s32.totalorder %s14_s7, %s134_s8  ;;  %p140_p2 = scmp.lt.s32.totalorder %s134_s8, %s134_s8 }
   0x6   :  { %p141_p3 = por %p140_p2, %p139_p1 }
   0x8   :  { %p142_p4 = pnand %p141_p3, %p135_p0 }
   0xa   :  { %145 = shalt.err (!%p142_p4)
}
   0xb   :  { %s171_s9 = smov 256   ;;  %s172_s10 = smov 16  }
   0xc   :  { %19 = dma.hbm_to_vmem [thread:$0]  %s196_s0, 512, %s14_s7, [#allocation5], %s171_s9, %s171_s9, %s172_s10  }
   0xd   :  { %166 = dma.done.wait [#allocation5], 512  }
   0xe   :  { %167 = vsyncadd [#allocation5], 4294966784  ;;  %v30_v0 = vld [vmem:[#allocation4] sm:$0xff]  ;;  %v31_v1 = vld [vmem:[#allocation4 + $0x8] sm:$0xff]  ;;  %vm27_vm0 = vcmask 58368   ;;  %v173_v12 = vmov 0.0   ;;  %v43_v13 = vlaneseq }
   0xf   :  { %v32_v2 = vld [vmem:[#allocation4 + $0x10] sm:$0xff]  ;;  %v35_v3 = vadd.f32 %v31_v1, %v30_v0  ;;  %v60_v4 = vmul.f32 %v30_v0, %v30_v0  ;;  %v61_v5 = vmul.f32 %v31_v1, %v31_v1  ;;  %v33_v6 = vld [vmem:[#allocation4 + $0x18] sm:$0xff]  ;;  %28 = vst.msk [vmem:[#allocation2] sm:$0x3] %vm27_vm0, %v173_v12  ;;  %29 = vst.msk [vmem:[#allocation3] sm:$0x3] %vm27_vm0, %v173_v12 }
  0x10   :  { %v62_v7 = vmul.f32 %v32_v2, %v32_v2  ;;  %v63_v8 = vmul.f32 %v33_v6, %v33_v6  ;;  %v38_v10 = vadd.f32 %v33_v6, %v32_v2  ;;  %v44_v14 = vand.u32 127, %v43_v13  ;;  %s174_s0 = smov [#allocation7]  }
  0x11   :  { %36 = vadd.xlane.f32.xlu0 %v35_v3  ;;  %v64_v9 = vadd.f32 %v61_v5, %v60_v4  ;;  %v46_v15 = vshrl.u32 %v43_v13, 7  ;;  %vm53_vm1 = vcmask 1041409   ;;  %s110_s13 = sshll.u32 %s174_s0, 4  ;;  %s111_s13 = int_to_ptr.vmem [resolvable:$true] %s110_s13 }
  0x12   :  { %v67_v11 = vadd.f32 %v63_v8, %v62_v7  ;;  %s146_s14 = scalar_lea.vmem %s111_s13, 32  ;;  %p151_p6 = scmp.lt.s32.totalorder %s111_s13, %s111_s13 }
  0x13   :  { %65 = vadd.xlane.f32.xlu1 %v64_v9  ;;  %v47_v17 = vsub.s32 %v44_v14, %v46_v15  ;;  %p147_p5 = scmp.ne.s32.totalorder %s111_s13, %s146_s14  ;;  %p152_p7 = scmp.lt.s32.totalorder %s146_s14, %s146_s14 }
  0x15   :  { %39 = vadd.xlane.f32.xlu0 %v38_v10  ;;  %p153_p8 = por %p152_p7, %p151_p6 }
  0x16   :  { %v34_v21 = vld [vmem:[#allocation2] sm:$0x3]  ;;  %v59_v26 = vld [vmem:[#allocation3] sm:$0x3] }
  0x17   :  { %68 = vadd.xlane.f32.xlu1 %v67_v11  ;;  %p154_p9 = pnand %p153_p8, %p147_p5 }
  0x9a   :  { %v37_v16 = vpop.xlane.xlu0 %36 }
  0x9b   :  { %v48_v20 = vrot.slane %v37_v16, %v47_v17 }
  0x9c   :  { %v66_v18 = vpop.xlane.xlu1 %65 }
  0x9d   :  { %v75_v24 = vrot.slane %v66_v18, %v47_v17 }
  0x9e   :  { %v40_v19 = vpop.xlane.xlu0 %39 }
  0x9f   :  { %v52_v22 = vrot.slane %v40_v19, %v47_v17 }
  0xa0   :  { %v69_v23 = vpop.xlane.xlu1 %68 }
  0xa1   :  { %v54_v25 = vsel %vm53_vm1, %v52_v22, %v48_v20  ;;  %v79_v27 = vrot.slane %v69_v23, %v47_v17 }
  0xa2   :  { %v56_v28 = vadd.f32 %v54_v25, %v34_v21 }
  0xa3   :  { %v80_v29 = vsel %vm53_vm1, %v79_v27, %v75_v24 }
  0xa4   :  { %58 = vst.msk [vmem:[#allocation2] sm:$0x3] %vm27_vm0, %v56_v28  ;;  %v82_v30 = vadd.f32 %v80_v29, %v59_v26 }
  0xa6   :  { %83 = vst.msk [vmem:[#allocation3] sm:$0x3] %vm27_vm0, %v82_v30 }
  0xab   :  { %v87_v31 = vld [vmem:[#allocation2] sm:$0x3] }
  0xac   :  { %v89_v32 = vmul.f32 %v87_v31, %v87_v31 }
  0xad   :  { %v88_v34 = vld [vmem:[#allocation3] sm:$0x3] }
  0xae   :  { %v91_v33 = vmul.f32 0.00390625, %v89_v32 }
  0xb0   :  { %v92_v35 = vsub.f32 %v88_v34, %v91_v33 }
  0xb2   :  { %v93_v36 = vmax.f32 %v92_v35, 0.0 }
  0xb4   :  { %v95_v37 = vmul.f32 0.003921569, %v93_v36 }
  0xb6   :  { %124 = vrsqrt.f32 %v95_v37  ;;  %vm98_vm2 = vcmp.eq.f32.partialorder %v95_v37, inf  ;;  %v101_v40 = vand.u32 2147483648, %v95_v37  ;;  %vm100_vm3 = vcmp.eq.f32.partialorder %v95_v37, 0.0 }
  0xc3   :  { %v125_v38 = vpop.eup %124 }
  0xc4   :  { %v97_v39 = vmul.f32 %v125_v38, %v95_v37 }
  0xc6   :  { %v99_v41 = vsel %vm98_vm2, %v95_v37, %v97_v39 }
  0xc7   :  { %v102_v42 = vsel %vm100_vm3, %v101_v40, %v99_v41 }
  0xc8   :  { %103 = vst.msk [vmem:[#allocation7] sm:$0x3] %vm27_vm0, %v102_v42 }
  0xc9   :  { %157 = shalt.err (!%p154_p9)
}
  0xca   :  { %113 = dma.vmem_to_hbm [thread:$0]  %s111_s13, 32, %s197_s1, [#allocation6]  }
  0xcb   :  { %168 = dma.done.wait [#allocation6], 32  }
  0xcc   :  { %169 = vsyncadd [#allocation6], 4294967264 }
  0xcd   :  { %117 = vsyncpa [#allocation5], 1 }
  0xce   :  { %118 = vsyncpa [#allocation6], 1 }

</bundles_post_ra>
